<compile_context>
chip_gen: v6e
topology: v6e:2x2x1
jax: 0.10.0
libtpu: 0.0.40
codegen_flags: <defaults>
</compile_context>

<pallas_src>
import jax
import jax.numpy as jnp
from jax.experimental import pallas as pl
from jax.experimental.pallas import tpu as pltpu

# Problem sizes implied by the module: obs has 13 components
# (x,y,z,qx,qy,qz,qw,vxb,vyb,vzb,rolldot,pitchdot,yawdot), action is 2-D,
# hiddens=[32,32].
OBS_DIM = 13
ACT_DIM = 2
HIDDENS = (32, 32)

SUB = 8      # sublane granularity
LANE = 128   # lane granularity


def _round_up(n, m):
    return ((n + m - 1) // m) * m


def _mlp_kernel(obs_ref, act_ref, w1o_ref, w1a_ref, b1_ref,
                w2_ref, b2_ref, w3_ref, b3_ref, o_ref):
    # Feature-major: activations are (features, TB); the batch rides the
    # 128-lane axis.  Three (plus one split) small-K MXU dots, VPU adds,
    # EUP tanh, one lane-dense store.  Weights are VMEM-resident.
    h1 = jnp.tanh(
        jnp.dot(w1o_ref[...], obs_ref[...], preferred_element_type=jnp.float32)
        + jnp.dot(w1a_ref[...], act_ref[...], preferred_element_type=jnp.float32)
        + b1_ref[...]
    )
    h2 = jnp.tanh(
        jnp.dot(w2_ref[...], h1, preferred_element_type=jnp.float32) + b2_ref[...]
    )
    o_ref[...] = (
        jnp.dot(w3_ref[...], h2, preferred_element_type=jnp.float32) + b3_ref[...]
    )


def _vmem_limit_bytes(tb, obs_dim, act_dim, h1_dim, h2_dim, out_dim):
    """Derive scoped VMEM from the real (double-buffered) tile bytes."""
    def tile_bytes(rows, cols):
        return _round_up(max(rows, 1), SUB) * _round_up(max(cols, 1), LANE) * 4

    stream = (tile_bytes(obs_dim, tb) + tile_bytes(act_dim, tb)
              + tile_bytes(out_dim, tb))                       # streamed I/O per buffer
    weights = (tile_bytes(h1_dim, obs_dim) + tile_bytes(h1_dim, act_dim)
               + tile_bytes(h2_dim, h1_dim) + tile_bytes(out_dim, h2_dim)
               + tile_bytes(h1_dim, 1) + tile_bytes(h2_dim, 1)
               + tile_bytes(out_dim, 1))                       # resident params
    inter = tile_bytes(h1_dim, tb) + tile_bytes(h2_dim, tb)    # h1/h2 intermediates
    est = 2 * stream + 2 * weights + inter + (4 << 20)         # 2x = double-buffering
    # Floor keeps the compiler comfortable; ceiling keeps >=16 MiB headroom on
    # v7x's 64 MiB physical VMEM per TensorCore.
    return min(max(est, 16 << 20), 48 << 20)


def _choose_tb(batch, tb_max):
    """Lane-multiple batch tile; >=2 tiles for large B (v7x dual-TC sharding)."""
    tb_max = max(LANE, _round_up(tb_max, LANE))
    b128 = _round_up(max(batch, 1), LANE)
    if b128 <= LANE:
        return LANE
    half = _round_up(pl.cdiv(b128, 2), LANE)
    return min(tb_max, half)


def residual_dynamics_forward(obs, action, params, *, tb_max=8192):
    """obs: (B, OBS_DIM), action: (B, ACT_DIM) -> residual (B, OBS_DIM)."""
    w1, b1, w2, b2, w3, b3 = params
    B = obs.shape[0]
    obs_dim = obs.shape[1]
    act_dim = action.shape[1]
    h1_dim = w1.shape[1]
    h2_dim = w2.shape[1]
    out_dim = w3.shape[1]

    tb = _choose_tb(B, tb_max)
    b_p = _round_up(B, tb)
    grid = (b_p // tb,)

    # Feature-major streams: (dim, B_pad).  The transpose + pad fuse into one
    # lane-dense XLA copy per tensor; the torch.cat is fused away entirely by
    # splitting W1 into obs/act halves below.
    obs_t = obs.astype(jnp.float32).T
    act_t = action.astype(jnp.float32).T
    if b_p != B:
        obs_t = jnp.pad(obs_t, ((0, 0), (0, b_p - B)))
        act_t = jnp.pad(act_t, ((0, 0), (0, b_p - B)))

    # Transposed / split weights so the kernel computes W^T @ x (batch on lanes).
    w1o_t = w1[:obs_dim, :].T.astype(jnp.float32)   # (h1, obs_dim)
    w1a_t = w1[obs_dim:, :].T.astype(jnp.float32)   # (h1, act_dim)
    w2_t = w2.T.astype(jnp.float32)                 # (h2, h1)
    w3_t = w3.T.astype(jnp.float32)                 # (out, h2)
    b1c = b1.reshape(h1_dim, 1).astype(jnp.float32)
    b2c = b2.reshape(h2_dim, 1).astype(jnp.float32)
    b3c = b3.reshape(out_dim, 1).astype(jnp.float32)

    out_t = pl.pallas_call(
        _mlp_kernel,
        out_shape=jax.ShapeDtypeStruct((out_dim, b_p), jnp.float32),
        grid_spec=pltpu.PrefetchScalarGridSpec(
            num_scalar_prefetch=0,
            grid=grid,
            in_specs=[
                pl.BlockSpec((obs_dim, tb), lambda i: (0, i)),      # streamed obs tile
                pl.BlockSpec((act_dim, tb), lambda i: (0, i)),      # streamed action tile
                pl.BlockSpec((h1_dim, obs_dim), lambda i: (0, 0)),  # resident W1_obs^T
                pl.BlockSpec((h1_dim, act_dim), lambda i: (0, 0)),  # resident W1_act^T
                pl.BlockSpec((h1_dim, 1), lambda i: (0, 0)),        # resident b1
                pl.BlockSpec((h2_dim, h1_dim), lambda i: (0, 0)),   # resident W2^T
                pl.BlockSpec((h2_dim, 1), lambda i: (0, 0)),        # resident b2
                pl.BlockSpec((out_dim, h2_dim), lambda i: (0, 0)),  # resident W3^T
                pl.BlockSpec((out_dim, 1), lambda i: (0, 0)),       # resident b3
            ],
            out_specs=pl.BlockSpec((out_dim, tb), lambda i: (0, i)),  # lane-dense out
        ),
        compiler_params=pltpu.CompilerParams(
            dimension_semantics=("parallel",),  # shards batch tiles across v7x TCs
            vmem_limit_bytes=_vmem_limit_bytes(tb, obs_dim, act_dim,
                                               h1_dim, h2_dim, out_dim),
        ),
    )(obs_t, act_t, w1o_t, w1a_t, b1c, w2_t, b2c, w3_t, b3c)

    # Back to (B, out_dim); transpose + tail slice fuse into one lane-dense copy.
    return out_t.T[:B]


def init_params(key, zero_init=True):
    """nn.Linear-style U(-1/sqrt(fan_in), 1/sqrt(fan_in)) init; last layer
    zero-filled when zero_init=True (as in the module). Weights stored as
    (in_features, out_features) so the reference computes x @ W."""
    in_dim = OBS_DIM + ACT_DIM
    dims = [in_dim, HIDDENS[0], HIDDENS[1], OBS_DIM]
    keys = jax.random.split(key, 6)
    params = []
    for i in range(3):
        fan_in = dims[i]
        bound = 1.0 / jnp.sqrt(fan_in)
        w = jax.random.uniform(keys[2 * i], (dims[i], dims[i + 1]),
                               minval=-bound, maxval=bound, dtype=jnp.float32)
        b = jax.random.uniform(keys[2 * i + 1], (dims[i + 1],),
                               minval=-bound, maxval=bound, dtype=jnp.float32)
        params.extend([w, b])
    if zero_init:
        params[4] = jnp.zeros_like(params[4])
        params[5] = jnp.zeros_like(params[5])
    return tuple(params)


def reference_forward(obs, action, params):
    w1, b1, w2, b2, w3, b3 = params
    x = jnp.concatenate([obs, action], axis=-1)
    h1 = jnp.tanh(x @ w1 + b1)
    h2 = jnp.tanh(h1 @ w2 + b2)
    return h2 @ w3 + b3


if __name__ == "__main__":
    key = jax.random.PRNGKey(0)
    k_obs, k_act, k_par = jax.random.split(key, 3)

    fwd = jax.jit(residual_dynamics_forward, static_argnames=("tb_max",))

    # Case 1: small batch, single 128-lane tile.  zero_init=False so the
    # output is non-trivial (module default zero_init=True zeroes W3/b3).
    B = 8
    obs = jax.random.normal(k_obs, (B, OBS_DIM), dtype=jnp.float32)
    action = jax.random.normal(k_act, (B, ACT_DIM), dtype=jnp.float32)
    params = init_params(k_par, zero_init=False)

    out = jax.block_until_ready(fwd(obs, action, params))
    ref = reference_forward(obs, action, params)
    assert out.shape == (B, OBS_DIM)
    assert jnp.allclose(out, ref, atol=1e-5, rtol=1e-5), "mismatch vs reference (B=8)"

    # Case 2: multi-tile batch grid + batch padding path
    # (tb_max=128 -> tb=128, padded batch 384, grid=(3,), weights stay resident).
    B2 = 300
    obs2 = jax.random.normal(k_obs, (B2, OBS_DIM), dtype=jnp.float32)
    act2 = jax.random.normal(k_act, (B2, ACT_DIM), dtype=jnp.float32)
    out2 = jax.block_until_ready(fwd(obs2, act2, params, tb_max=128))
    ref2 = reference_forward(obs2, act2, params)
    assert out2.shape == (B2, OBS_DIM)
    assert jnp.allclose(out2, ref2, atol=1e-5, rtol=1e-5), "mismatch vs reference (grid)"

    # Case 3: default tb_max with B large enough to force the >=2-tile split
    # (b128=384 -> tb=256, grid=(2,)) -- the v7x dual-TC sharding path.
    B3 = 260
    obs3 = jax.random.normal(k_obs, (B3, OBS_DIM), dtype=jnp.float32)
    act3 = jax.random.normal(k_act, (B3, ACT_DIM), dtype=jnp.float32)
    out3 = jax.block_until_ready(fwd(obs3, act3, params))
    ref3 = reference_forward(obs3, act3, params)
    assert out3.shape == (B3, OBS_DIM)
    assert jnp.allclose(out3, ref3, atol=1e-5, rtol=1e-5), "mismatch vs reference (2-tile)"

    # Case 4: module default zero_init=True -> residual MLP outputs exactly zero.
    zparams = init_params(k_par, zero_init=True)
    out0 = jax.block_until_ready(fwd(obs, action, zparams))
    assert jnp.allclose(out0, jnp.zeros_like(out0)), "zero_init output not zero"

    # TODO(synk): predict()/get_model_predictions() (analytical model rollout,
    # quaternion update, observation normalizers) are outside forward() and
    # are not part of this kernel.
    print("KERNEL_OK")
</pallas_src>

<mosaic_0001>
module attributes {stable_mosaic.version = 11 : i64} {
  func.func @_mlp_kernel(%arg0: i32, %arg1: memref<13x128xf32, #tpu.memory_space<vmem>>, %arg2: memref<2x128xf32, #tpu.memory_space<vmem>>, %arg3: memref<32x13xf32, #tpu.memory_space<vmem>>, %arg4: memref<32x2xf32, #tpu.memory_space<vmem>>, %arg5: memref<32x1xf32, #tpu.memory_space<vmem>>, %arg6: memref<32x32xf32, #tpu.memory_space<vmem>>, %arg7: memref<32x1xf32, #tpu.memory_space<vmem>>, %arg8: memref<13x32xf32, #tpu.memory_space<vmem>>, %arg9: memref<13x1xf32, #tpu.memory_space<vmem>>, %arg10: memref<13x128xf32, #tpu.memory_space<vmem>>) attributes {dimension_semantics = [#tpu.dimension_semantics<parallel>], iteration_bounds = array<i64: 1>, scalar_prefetch = 0 : i64, scratch_operands = 0 : i64, tpu.core_type = #tpu.core_type<tc>, window_params = [{transform_indices = @transform_0, window_bounds = array<i64: 13, 128>}, {transform_indices = @transform_1, window_bounds = array<i64: 2, 128>}, {pipeline_mode = #tpu.pipeline_mode<synchronous>, transform_indices = @transform_2, window_bounds = array<i64: 32, 13>}, {pipeline_mode = #tpu.pipeline_mode<synchronous>, transform_indices = @transform_3, window_bounds = array<i64: 32, 2>}, {pipeline_mode = #tpu.pipeline_mode<synchronous>, transform_indices = @transform_4, window_bounds = array<i64: 32, 1>}, {pipeline_mode = #tpu.pipeline_mode<synchronous>, transform_indices = @transform_5, window_bounds = array<i64: 32, 32>}, {pipeline_mode = #tpu.pipeline_mode<synchronous>, transform_indices = @transform_6, window_bounds = array<i64: 32, 1>}, {pipeline_mode = #tpu.pipeline_mode<synchronous>, transform_indices = @transform_7, window_bounds = array<i64: 13, 32>}, {pipeline_mode = #tpu.pipeline_mode<synchronous>, transform_indices = @transform_8, window_bounds = array<i64: 13, 1>}, {transform_indices = @transform_9, window_bounds = array<i64: 13, 128>}]} {
    %c0 = arith.constant 0 : index
    %c0_0 = arith.constant 0 : index
    %0 = vector.load %arg3[%c0, %c0_0] : memref<32x13xf32, #tpu.memory_space<vmem>>, vector<32x13xf32>
    %c0_1 = arith.constant 0 : index
    %c0_2 = arith.constant 0 : index
    %1 = vector.load %arg1[%c0_1, %c0_2] : memref<13x128xf32, #tpu.memory_space<vmem>>, vector<13x128xf32>
    %cst = arith.constant dense<0.000000e+00> : vector<32x128xf32>
    %2 = tpu.matmul %0, %1, %cst {dimension_numbers = #tpu.dot_dimension_numbers<[1], [0], [0], [1], [0, 0, 1, 1], [], []>} : vector<32x13xf32>, vector<13x128xf32>, vector<32x128xf32> -> vector<32x128xf32>
    %c0_3 = arith.constant 0 : index
    %c0_4 = arith.constant 0 : index
    %3 = vector.load %arg4[%c0_3, %c0_4] : memref<32x2xf32, #tpu.memory_space<vmem>>, vector<32x2xf32>
    %c0_5 = arith.constant 0 : index
    %c0_6 = arith.constant 0 : index
    %4 = vector.load %arg2[%c0_5, %c0_6] : memref<2x128xf32, #tpu.memory_space<vmem>>, vector<2x128xf32>
    %cst_7 = arith.constant dense<0.000000e+00> : vector<32x128xf32>
    %5 = tpu.matmul %3, %4, %cst_7 {dimension_numbers = #tpu.dot_dimension_numbers<[1], [0], [0], [1], [0, 0, 1, 1], [], []>} : vector<32x2xf32>, vector<2x128xf32>, vector<32x128xf32> -> vector<32x128xf32>
    %6 = arith.addf %2, %5 : vector<32x128xf32>
    %c0_8 = arith.constant 0 : index
    %c0_9 = arith.constant 0 : index
    %7 = vector.load %arg5[%c0_8, %c0_9] : memref<32x1xf32, #tpu.memory_space<vmem>>, vector<32x1xf32>
    %8 = vector.broadcast %7 : vector<32x1xf32> to vector<32x128xf32>
    %9 = arith.addf %6, %8 : vector<32x128xf32>
    %10 = math.tanh %9 : vector<32x128xf32>
    %c0_10 = arith.constant 0 : index
    %c0_11 = arith.constant 0 : index
    %11 = vector.load %arg6[%c0_10, %c0_11] : memref<32x32xf32, #tpu.memory_space<vmem>>, vector<32x32xf32>
    %cst_12 = arith.constant dense<0.000000e+00> : vector<32x128xf32>
    %12 = tpu.matmul %11, %10, %cst_12 {dimension_numbers = #tpu.dot_dimension_numbers<[1], [0], [0], [1], [0, 0, 1, 1], [], []>} : vector<32x32xf32>, vector<32x128xf32>, vector<32x128xf32> -> vector<32x128xf32>
    %c0_13 = arith.constant 0 : index
    %c0_14 = arith.constant 0 : index
    %13 = vector.load %arg7[%c0_13, %c0_14] : memref<32x1xf32, #tpu.memory_space<vmem>>, vector<32x1xf32>
    %14 = vector.broadcast %13 : vector<32x1xf32> to vector<32x128xf32>
    %15 = arith.addf %12, %14 : vector<32x128xf32>
    %16 = math.tanh %15 : vector<32x128xf32>
    %c0_15 = arith.constant 0 : index
    %c0_16 = arith.constant 0 : index
    %17 = vector.load %arg8[%c0_15, %c0_16] : memref<13x32xf32, #tpu.memory_space<vmem>>, vector<13x32xf32>
    %cst_17 = arith.constant dense<0.000000e+00> : vector<13x128xf32>
    %18 = tpu.matmul %17, %16, %cst_17 {dimension_numbers = #tpu.dot_dimension_numbers<[1], [0], [0], [1], [0, 0, 1, 1], [], []>} : vector<13x32xf32>, vector<32x128xf32>, vector<13x128xf32> -> vector<13x128xf32>
    %c0_18 = arith.constant 0 : index
    %c0_19 = arith.constant 0 : index
    %19 = vector.load %arg9[%c0_18, %c0_19] : memref<13x1xf32, #tpu.memory_space<vmem>>, vector<13x1xf32>
    %20 = vector.broadcast %19 : vector<13x1xf32> to vector<13x128xf32>
    %21 = arith.addf %18, %20 : vector<13x128xf32>
    %c0_20 = arith.constant 0 : index
    %c0_21 = arith.constant 0 : index
    %22 = vector.load %arg10[%c0_20, %c0_21] : memref<13x128xf32, #tpu.memory_space<vmem>>, vector<13x128xf32>
    tpu.vector_store %arg10[%c0_20, %c0_21], %21 {strides = array<i32>} : memref<13x128xf32, #tpu.memory_space<vmem>>, vector<13x128xf32>,
    return
  }
  func.func @transform_0(%arg0: i32) -> (i32, i32) {
    %c0_i32 = arith.constant 0 : i32
    %c0_i32_0 = arith.constant 0 : i32
    return %c0_i32, %arg0 : i32, i32
  }
  func.func @transform_1(%arg0: i32) -> (i32, i32) {
    %c0_i32 = arith.constant 0 : i32
    %c0_i32_0 = arith.constant 0 : i32
    return %c0_i32, %arg0 : i32, i32
  }
  func.func @transform_2(%arg0: i32) -> (i32, i32) {
    %c0_i32 = arith.constant 0 : i32
    %c0_i32_0 = arith.constant 0 : i32
    %c0_i32_1 = arith.constant 0 : i32
    return %c0_i32, %c0_i32_0 : i32, i32
  }
  func.func @transform_3(%arg0: i32) -> (i32, i32) {
    %c0_i32 = arith.constant 0 : i32
    %c0_i32_0 = arith.constant 0 : i32
    %c0_i32_1 = arith.constant 0 : i32
    return %c0_i32, %c0_i32_0 : i32, i32
  }
  func.func @transform_4(%arg0: i32) -> (i32, i32) {
    %c0_i32 = arith.constant 0 : i32
    %c0_i32_0 = arith.constant 0 : i32
    %c0_i32_1 = arith.constant 0 : i32
    return %c0_i32, %c0_i32_0 : i32, i32
  }
  func.func @transform_5(%arg0: i32) -> (i32, i32) {
    %c0_i32 = arith.constant 0 : i32
    %c0_i32_0 = arith.constant 0 : i32
    %c0_i32_1 = arith.constant 0 : i32
    return %c0_i32, %c0_i32_0 : i32, i32
  }
  func.func @transform_6(%arg0: i32) -> (i32, i32) {
    %c0_i32 = arith.constant 0 : i32
    %c0_i32_0 = arith.constant 0 : i32
    %c0_i32_1 = arith.constant 0 : i32
    return %c0_i32, %c0_i32_0 : i32, i32
  }
  func.func @transform_7(%arg0: i32) -> (i32, i32) {
    %c0_i32 = arith.constant 0 : i32
    %c0_i32_0 = arith.constant 0 : i32
    %c0_i32_1 = arith.constant 0 : i32
    return %c0_i32, %c0_i32_0 : i32, i32
  }
  func.func @transform_8(%arg0: i32) -> (i32, i32) {
    %c0_i32 = arith.constant 0 : i32
    %c0_i32_0 = arith.constant 0 : i32
    %c0_i32_1 = arith.constant 0 : i32
    return %c0_i32, %c0_i32_0 : i32, i32
  }
  func.func @transform_9(%arg0: i32) -> (i32, i32) {
    %c0_i32 = arith.constant 0 : i32
    %c0_i32_0 = arith.constant 0 : i32
    return %c0_i32, %arg0 : i32, i32
  }
}

</mosaic_0001>

<bundles_post_ra>
// kernel: residual_dynamics_forward.1
= control target key start
LH: loop header
LB: loop body
LE: loop exit
PB: predicated region body
PF: predicated region fallthrough
CT: control target
= control target key end

     0   :  { %vm56_vm0 = vcmask 1041408   ;;  %vm158_vm1 = vcmask 1044480   ;;  %vm43_vm2 = vcmask 15360   ;;  %vm145_vm3 = vcmask 105472   ;;  %s767_s1 = inlined_call_operand.vmem [shape: f32[2,128], index: 1, kind: input, shape index: {}]   ;;  %s768_s0 = inlined_call_operand.vmem [shape: f32[13,128], index: 0, kind: input, shape index: {}]   ;;  %s769_s3 = inlined_call_operand.vmem [shape: f32[32,2], index: 3, kind: input, shape index: {}]   ;;  %s770_s2 = inlined_call_operand.vmem [shape: f32[32,13], index: 2, kind: input, shape index: {}]   ;;  %s771_s4 = inlined_call_operand.vmem [shape: f32[32,1], index: 4, kind: input, shape index: {}]   ;;  %s772_s6 = inlined_call_operand.vmem [shape: f32[32,1], index: 6, kind: input, shape index: {}]   ;;  %s773_s8 = inlined_call_operand.vmem [shape: f32[13,1], index: 8, kind: input, shape index: {}]   ;;  %s774_s5 = inlined_call_operand.vmem [shape: f32[32,32], index: 5, kind: input, shape index: {}]   ;;  %s775_s7 = inlined_call_operand.vmem [shape: f32[13,32], index: 7, kind: input, shape index: {}]   ;;  %s776_s9 = inlined_call_operand.vmem [shape: f32[13,128], index: 9, kind: output, shape index: {}]  }
   0x1   :  { %v42_v0 = vld [vmem:[%s767_s1] sm:$0x3]  ;;  %v37_v1 = vld [vmem:[%s768_s0 + $0x8] sm:$0x1f]  ;;  %v40_v6 = vld [vmem:[%s769_s3 + $0x10] sm:$0xff]  ;;  %v613_v11 = vmov 0  }
   0x2   :  { %v38_v2 = vld [vmem:[%s769_s3] sm:$0xff]  ;;  %551 = vmatprep.subr.msk.mxu0 %vm56_vm0, %v42_v0  ;;  %559 = vmatprep.subr.msk.mxu1 %vm158_vm1, %v37_v1  ;;  %v39_v3 = vld [vmem:[%s769_s3 + $0x8] sm:$0xff]  ;;  %v41_v8 = vld [vmem:[%s769_s3 + $0x18] sm:$0xff]  ;;  %vm307_vm4 = vcmask 261120  }
   0x3   :  { %v36_v4 = vld [vmem:[%s768_s0] sm:$0xff]  ;;  %552 = vmatpush3.msk.msra.mxu0 %vm56_vm0, %v42_v0  ;;  %553 = vmatprep.mubr.msk.f32.mxu0 %vm43_vm2, %v38_v2  ;;  %v33_v7 = vld [vmem:[%s770_s2 + $0x8] sm:$0xff]  ;;  %v34_v9 = vld [vmem:[%s770_s2 + $0x10] sm:$0xff] }
   0x4   :  { %v32_v5 = vld [vmem:[%s770_s2] sm:$0xff]  ;;  %560 = vmatpush3.msk.msra.mxu1 %vm158_vm1, %v37_v1  ;;  %554 = vmatmul.mubr.msk.f32.vlgmr.msra.gmra.mxu0 %vm43_vm2, %v39_v3  ;;  %v250_v10 = vld [vmem:[%s771_s4 + $0x18] sm:$0xff]  ;;  %v248_v12 = vld [vmem:[%s771_s4 + $0x8] sm:$0xff] }
   0x5   :  { %561 = vmatprep.subr.mxu1 %v36_v4  ;;  %563 = vmatprep.mubr.msk.f32.mxu1 %vm145_vm3, %v32_v5  ;;  %v35_v13 = vld [vmem:[%s770_s2 + $0x18] sm:$0xff]  ;;  %v249_v14 = vld [vmem:[%s771_s4 + $0x10] sm:$0xff]  ;;  %v247_v15 = vld [vmem:[%s771_s4] sm:$0xff] }
   0x6   :  { %562 = vmatpush3.msra.mxu1 %v36_v4  ;;  %556 = vmatprep.mubr.msk.f32.mxu0 %vm43_vm2, %v40_v6  ;;  %v286_v16 = vld [vmem:[%s772_s6 + $0x18] sm:$0xff]  ;;  %v285_v17 = vld [vmem:[%s772_s6 + $0x10] sm:$0xff]  ;;  %v284_v18 = vld [vmem:[%s772_s6 + $0x8] sm:$0xff] }
   0x7   :  { %564 = vmatmul.mubr.msk.f32.vlgmr.msra.gmra.mxu1 %vm145_vm3, %v33_v7  ;;  %595 = vset.pattern.permute.xlu0 %v613_v11  ;;  %v283_v19 = vld [vmem:[%s772_s6] sm:$0xff]  ;;  %v412_v21 = vld [vmem:[%s773_s8 + $0x8] sm:$0x1f]  ;;  %v281_v48 = vld [vmem:[%s774_s5 + $0x10] sm:$0xff] }
   0x8   :  { %557 = vmatmul.mubr.msk.f32.gmra.mxu0 %vm43_vm2, %v41_v8  ;;  %566 = vmatprep.mubr.msk.f32.mxu1 %vm145_vm3, %v34_v9  ;;  %v411_v20 = vld [vmem:[%s773_s8] sm:$0xff]  ;;  %v280_v47 = vld [vmem:[%s774_s5 + $0x8] sm:$0xff]  ;;  %v282_v49 = vld [vmem:[%s774_s5 + $0x18] sm:$0xff] }
   0x9   :  { %268 = vperm.xlu0 %595, %v250_v10   ;;  %596 = vset.pattern.permute.xlu1 %v613_v11  ;;  %v279_v22 = vld [vmem:[%s774_s5] sm:$0xff]  ;;  %v410_v3 = vld [vmem:[%s775_s7 + $0x8] sm:$0x1f] }
   0xa   :  { %258 = vperm.xlu1 %596, %v248_v12   ;;  %577 = vmatprep.mubr.msk.f32.mxu0 %vm307_vm4, %v279_v22  ;;  %v409_v50 = vld [vmem:[%s775_s7] sm:$0xff] }
   0xb   :  { %567 = vmatmul.mubr.msk.f32.gmra.mxu1 %vm145_vm3, %v35_v13 }
   0xc   :  { %591 = vmatprep.mubr.msk.f32.mxu1 %vm307_vm4, %v409_v50 }
   0xd   :  { %263 = vperm.xlu0 %595, %v249_v14  }
   0xe   :  { %253 = vperm.xlu1 %596, %v247_v15  }
  0x11   :  { %304 = vperm.xlu0 %595, %v286_v16  }
  0x12   :  { %299 = vperm.xlu1 %596, %v285_v17  }
  0x15   :  { %294 = vperm.xlu0 %595, %v284_v18  }
  0x16   :  { %289 = vperm.xlu1 %596, %v283_v19  }
  0x19   :  { %415 = vperm.xlu0 %595, %v411_v20  }
  0x1a   :  { %420 = vperm.xlu1 %596, %v412_v21  }
  0x84   :  { %v269_v26 = vpop.permute.xlu0 %268 }
  0x85   :  { %v259_v29 = vpop.permute.xlu1 %258 }
  0x88   :  { %v264_v38 = vpop.permute.xlu0 %263 }
  0x89   :  { %v254_v41 = vpop.permute.xlu1 %253 }
  0x8c   :  { %v305_v51 = vpop.permute.xlu0 %304 }
  0x8d   :  { %v300_v53 = vpop.permute.xlu1 %299 }
  0x90   :  { %v295_v57 = vpop.permute.xlu0 %294 }
  0x91   :  { %v290_v61 = vpop.permute.xlu1 %289 }
  0x94   :  { %v416_v7 = vpop.permute.xlu0 %415 }
  0x95   :  { %v421_v4 = vpop.permute.xlu1 %420 }
  0xc4   :  { %v555_v23 = vpop.f32.mrf.mxu0 }
  0xc6   :  { %v126_v24 = vpop.f32.mrf.mxu0 }
  0xc7   :  { %v565_v25 = vpop.f32.mrf.mxu1 }
  0xc8   :  { %v558_v27 = vpop.f32.mrf.mxu0  ;;  %v234_v31 = vadd.f32 %v565_v25, %v555_v23 }
  0xc9   :  { %v228_v28 = vpop.f32.mrf.mxu1 }
  0xca   :  { %v136_v33 = vpop.f32.mrf.mxu0  ;;  %v229_v35 = vadd.f32 %v228_v28, %v126_v24  ;;  %v272_v39 = vadd.f32 %v259_v29, %v234_v31 }
  0xcb   :  { %v568_v30 = vpop.f32.mrf.mxu1 }
  0xcc   :  { %v244_v32 = vadd.f32 %v568_v30, %v558_v27  ;;  %v271_v42 = vadd.f32 %v254_v41, %v229_v35 }
  0xcd   :  { %v238_v34 = vpop.f32.mrf.mxu1 }
  0xce   :  { %v274_v36 = vadd.f32 %v269_v26, %v244_v32  ;;  %v239_v37 = vadd.f32 %v238_v34, %v136_v33 }
  0xd0   :  { %597 = vtanh.f32 %v274_v36  ;;  %v273_v40 = vadd.f32 %v264_v38, %v239_v37 }
  0xd2   :  { %599 = vtanh.f32 %v273_v40 }
  0xd3   :  { %601 = vtanh.f32 %v272_v39 }
  0xd4   :  { %603 = vtanh.f32 %v271_v42 }
  0xdd   :  { %v598_v43 = vpop.eup %597 }
  0xde   :  { %569 = vmatprep.subr.mxu0 %v598_v43 }
  0xdf   :  { %v600_v44 = vpop.eup %599  ;;  %570 = vmatpush3.msra.mxu0 %v598_v43 }
  0xe0   :  { %571 = vmatprep.subr.mxu0 %v600_v44  ;;  %v602_v45 = vpop.eup %601 }
  0xe1   :  { %572 = vmatpush3.msra.mxu0 %v600_v44  ;;  %v604_v46 = vpop.eup %603 }
  0xe2   :  { %573 = vmatprep.subr.mxu0 %v602_v45 }
  0xe3   :  { %574 = vmatpush3.msra.mxu0 %v602_v45 }
  0xe4   :  { %575 = vmatprep.subr.mxu0 %v604_v46 }
  0xe5   :  { %576 = vmatpush3.msra.mxu0 %v604_v46 }
  0xe6   :  { %578 = vmatmul.mubr.msk.f32.vlgmr.msra.gmra.mxu0 %vm307_vm4, %v280_v47 }
  0xe7   :  { %580 = vmatprep.mubr.msk.f32.mxu0 %vm307_vm4, %v281_v48 }
  0xea   :  { %581 = vmatmul.mubr.msk.f32.gmra.mxu0 %vm307_vm4, %v282_v49 }
 0x1a6   :  { %v579_v52 = vpop.f32.mrf.mxu0 }
 0x1a7   :  { %v392_v59 = vadd.f32 %v579_v52, %v295_v57 }
 0x1a8   :  { %v386_v54 = vpop.f32.mrf.mxu0 }
 0x1a9   :  { %v387_v62 = vadd.f32 %v386_v54, %v290_v61 }
 0x1aa   :  { %v582_v55 = vpop.f32.mrf.mxu0 }
 0x1ab   :  { %v402_v56 = vadd.f32 %v582_v55, %v305_v51 }
 0x1ac   :  { %v396_v58 = vpop.f32.mrf.mxu0 }
 0x1ad   :  { %605 = vtanh.f32 %v402_v56  ;;  %v397_v60 = vadd.f32 %v396_v58, %v300_v53 }
 0x1af   :  { %607 = vtanh.f32 %v397_v60 }
 0x1b0   :  { %609 = vtanh.f32 %v392_v59 }
 0x1b1   :  { %611 = vtanh.f32 %v387_v62 }
 0x1ba   :  { %v606_v63 = vpop.eup %605 }
 0x1bb   :  { %583 = vmatprep.subr.mxu1 %v606_v63 }
 0x1bc   :  { %v608_v0 = vpop.eup %607  ;;  %584 = vmatpush3.msra.mxu1 %v606_v63 }
 0x1bd   :  { %585 = vmatprep.subr.mxu1 %v608_v0  ;;  %v610_v1 = vpop.eup %609 }
 0x1be   :  { %586 = vmatpush3.msra.mxu1 %v608_v0  ;;  %v612_v2 = vpop.eup %611 }
 0x1bf   :  { %587 = vmatprep.subr.mxu1 %v610_v1 }
 0x1c0   :  { %588 = vmatpush3.msra.mxu1 %v610_v1 }
 0x1c1   :  { %589 = vmatprep.subr.mxu1 %v612_v2 }
 0x1c2   :  { %590 = vmatpush3.msra.mxu1 %v612_v2 }
 0x1c3   :  { %592 = vmatmul.mubr.msk.f32.vlgmr.msra.gmra.mxu1 %vm307_vm4, %v410_v3 }
 0x283   :  { %v593_v5 = vpop.f32.mrf.mxu1 }
 0x284   :  { %v501_v6 = vadd.f32 %v593_v5, %v421_v4 }
 0x285   :  { %v495_v8 = vpop.f32.mrf.mxu1 }
 0x286   :  { %505 = vst [vmem:[%s776_s9 + $0x8] sm:$0x1f] %v501_v6  ;;  %v496_v9 = vadd.f32 %v495_v8, %v416_v7 }
 0x288   :  { %504 = vst [vmem:[%s776_s9] sm:$0xff] %v496_v9 }

</bundles_post_ra>
